<compile_context>
chip_gen: v7x
topology: tpu7x:2x2x1
jax: 0.10.0
libtpu: 0.0.40
codegen_flags: <defaults>
</compile_context>

<pallas_src>
import jax
import jax.numpy as jnp
from jax.experimental import pallas as pl
from jax.experimental.pallas import tpu as pltpu


def _round_up(x, m):
    return ((x + m - 1) // m) * m


# ----------------------------- Pallas kernels ------------------------------

def _stats_kernel(xg_ref, wg_ref, stats_ref):
    # xg: (G, R*Cin); wg: (R*Cin, R*Ncols_pad) block-diagonal replication of W.
    # Emit per-column partial sum (sublane 0) and sum-of-squares (sublane 1).
    y = jnp.dot(xg_ref[...], wg_ref[...], preferred_element_type=jnp.float32)
    col_sum = jnp.sum(y, axis=0, keepdims=True)          # (1, RN)
    col_sq = jnp.sum(y * y, axis=0, keepdims=True)       # (1, RN)
    pad = jnp.zeros((6, y.shape[1]), jnp.float32)
    stats_ref[...] = jnp.concatenate([col_sum, col_sq, pad], axis=0)


def _apply_kernel(xg_ref, wg_ref, shift_ref, o_ref):
    # Recompute x @ (W * bn_scale), add folded shift, LeakyReLU(0.2).
    y = jnp.dot(xg_ref[...], wg_ref[...], preferred_element_type=jnp.float32)
    y = y + shift_ref[...]
    o_ref[...] = jnp.where(y >= 0.0, y, 0.2 * y)


# ------------------------------- wrapper ------------------------------------

def upscale_block_forward(x, w, b, gamma, beta, *, scale_factor=2, eps=1e-5):
    """Forward of UpscaleBlock: ConvTranspose2d(k=s,stride=s) -> BatchNorm2d
    (training-mode batch stats) -> LeakyReLU(0.2).

    x: (N, Cin, H, W); w: (Cin, Cout, s, s) (PyTorch ConvTranspose2d layout);
    b/gamma/beta: (Cout,). Returns (N, Cout, H*s, W*s) in NCHW like PyTorch.

    The conv bias `b` cancels exactly through train-mode BatchNorm (mean
    subtraction), so it is accepted but never used.
    """
    del b  # exactly cancelled by BN mean subtraction
    N, Cin, H, W = x.shape
    s = int(scale_factor)
    Cout = w.shape[1]
    M = N * H * W
    Ncols = Cout * s * s

    f32 = jnp.float32
    # NOTE: on v6e/v7x, xg/wg could be carried in bfloat16 (f32 accumulation
    # via preferred_element_type) to halve HBM traffic; kept f32 to match the
    # f32 PyTorch reference tightly.
    xf = jnp.transpose(x, (0, 2, 3, 1)).reshape(M, Cin).astype(f32)
    wf = w.astype(f32).reshape(Cin, Ncols)

    # Lane-dense column layout for any channel count:
    #  * Ncols multiple of 128  -> use as is, R = 1.
    #  * Ncols < 128            -> zero-pad to next power of two (divides 128)
    #                              and pack R = 128/Ncols_pad positions per row.
    #  * Ncols > 128, non-mult  -> full extent as the block (mostly-dense vst).
    LANE = 128
    if Ncols % LANE == 0:
        Ncols_pad, R = Ncols, 1
    elif Ncols < LANE:
        Ncols_pad = int(pl.next_power_of_2(Ncols))       # divides 128
        R = LANE // Ncols_pad
    else:
        Ncols_pad, R = Ncols, 1
    wf_p = jnp.pad(wf, ((0, 0), (0, Ncols_pad - Ncols))) if Ncols_pad != Ncols else wf

    RN = R * Ncols_pad
    RK = R * Cin

    # Tile sizing: largest grouped-row tile whose double-buffered in+out blocks
    # stay under ~24 MiB (safe within raised scoped VMEM on v5e/v6e and within
    # v7x's 64 MiB physical VMEM).
    budget = 24 * 1024 * 1024
    bytes_per_row = 2 * 4 * (RN + RK)                    # f32, double-buffered
    g_cap = max(8, min(2048, (budget // bytes_per_row) // 8 * 8))

    Mg = -(-M // R)                                      # ceil(M / R)
    if Mg <= g_cap:
        G = _round_up(Mg, 8)
        Mg_pad = G
    else:
        G = g_cap
        Mg_pad = _round_up(Mg, G)
    M_pad = Mg_pad * R
    num_tiles = Mg_pad // G

    # Zero-pad rows only if needed: padded rows contribute 0 to the sums /
    # sums-of-squares (no bias), and their pass-2 outputs are sliced off.
    xf_use = jnp.pad(xf, ((0, M_pad - M), (0, 0))) if M_pad != M else xf
    xg = xf_use.reshape(Mg_pad, RK)                      # free row-major regroup

    eye_r = jnp.eye(R, dtype=f32)
    wg = jnp.kron(eye_r, wf_p)                           # (RK, RN) block-diag

    cparams = pltpu.CompilerParams(
        dimension_semantics=("parallel",),               # megacore-shardable
        vmem_limit_bytes=48 * 1024 * 1024,
    )
    grid = (num_tiles,)

    # ---- pass 1: per-column partial sums / sums-of-squares (the full-size
    # activation never round-trips through HBM) ----
    stats = pl.pallas_call(
        _stats_kernel,
        out_shape=jax.ShapeDtypeStruct((num_tiles * 8, RN), f32),
        grid=grid,
        in_specs=[
            pl.BlockSpec((G, RK), lambda i: (i, 0)),
            pl.BlockSpec((RK, RN), lambda i: (0, 0)),
        ],
        out_specs=pl.BlockSpec((8, RN), lambda i: (i, 0)),
        compiler_params=cparams,
    )(xg, wg)

    # ---- tiny glue: per-channel train-mode batch stats, fold BN into W ----
    stats = stats.reshape(num_tiles, 8, RN)
    col_sum = jnp.sum(stats[:, 0, :], axis=0).reshape(R, Ncols_pad)[:, :Ncols]
    col_sq = jnp.sum(stats[:, 1, :], axis=0).reshape(R, Ncols_pad)[:, :Ncols]
    count = jnp.float32(M * s * s)
    ch_sum = col_sum.reshape(R, Cout, s * s).sum(axis=(0, 2))
    ch_sq = col_sq.reshape(R, Cout, s * s).sum(axis=(0, 2))
    mean = ch_sum / count
    var = jnp.maximum(ch_sq / count - mean * mean, 0.0)   # biased (train-mode)

    scale_c = gamma.astype(f32) / jnp.sqrt(var + eps)
    shift_c = beta.astype(f32) - mean * scale_c
    scale_cols = jnp.repeat(scale_c, s * s)               # (Ncols,)
    shift_cols = jnp.repeat(shift_c, s * s)                # (Ncols,)
    if Ncols_pad != Ncols:
        scale_cols = jnp.pad(scale_cols, (0, Ncols_pad - Ncols))
        shift_cols = jnp.pad(shift_cols, (0, Ncols_pad - Ncols))
    wg_folded = jnp.kron(eye_r, wf_p * scale_cols[None, :])  # (RK, RN)
    shift_g = jnp.tile(shift_cols, R)[None, :]                # (1, RN)

    # ---- pass 2: recompute x @ W' (K is tiny, recompute ~free), add shift,
    # LeakyReLU, write the final activations exactly once ----
    out_g = pl.pallas_call(
        _apply_kernel,
        out_shape=jax.ShapeDtypeStruct((Mg_pad, RN), f32),
        grid=grid,
        in_specs=[
            pl.BlockSpec((G, RK), lambda i: (i, 0)),
            pl.BlockSpec((RK, RN), lambda i: (0, 0)),
            pl.BlockSpec((1, RN), lambda i: (0, 0)),
        ],
        out_specs=pl.BlockSpec((G, RN), lambda i: (i, 0)),
        compiler_params=cparams,
    )(xg, wg_folded, shift_g)

    # Ungroup (free row-major reshape) + single fused XLA NCHW interleave.
    out_flat = out_g.reshape(M_pad, Ncols_pad)[:M, :Ncols]
    out = out_flat.reshape(N, H, W, Cout, s, s)
    out = jnp.transpose(out, (0, 3, 1, 4, 2, 5)).reshape(N, Cout, H * s, W * s)
    return out


# ------------------------------ reference -----------------------------------

def _reference(x, w, b, gamma, beta, *, scale_factor=2, eps=1e-5):
    """Pure-JAX reference of the PyTorch forward (train-mode BatchNorm)."""
    N, Cin, H, W = x.shape
    s = int(scale_factor)
    Cout = w.shape[1]
    xf = x.astype(jnp.float32)
    wf = w.astype(jnp.float32)
    # ConvTranspose2d with kernel_size == stride == s (non-overlapping blocks):
    # out[n, c, h*s+a, w*s+b] = sum_k x[n,k,h,w] * W[k,c,a,b]
    y = jnp.einsum("nkhw,kcab->nchawb", xf, wf,
                   precision=jax.lax.Precision.HIGHEST)
    y = y.reshape(N, Cout, H * s, W * s) + b.astype(jnp.float32)[None, :, None, None]
    mean = jnp.mean(y, axis=(0, 2, 3), keepdims=True)
    var = jnp.mean((y - mean) ** 2, axis=(0, 2, 3), keepdims=True)
    yhat = (y - mean) / jnp.sqrt(var + eps)
    yhat = yhat * gamma.astype(jnp.float32)[None, :, None, None] \
         + beta.astype(jnp.float32)[None, :, None, None]
    return jnp.where(yhat >= 0.0, yhat, 0.2 * yhat)


if __name__ == "__main__":
    key = jax.random.PRNGKey(0)
    k_x, k_w, k_b, k_g, k_be = jax.random.split(key, 5)

    N, Cin, H, W = 2, 4, 16, 16
    Cout, s = 8, 2

    x = jax.random.normal(k_x, (N, Cin, H, W), dtype=jnp.float32)
    # ConvTranspose2d weight shape: (in_channels, out_channels, kH, kW)
    w = 0.1 * jax.random.normal(k_w, (Cin, Cout, s, s), dtype=jnp.float32)
    b = 0.05 * jax.random.normal(k_b, (Cout,), dtype=jnp.float32)
    gamma = 1.0 + 0.1 * jax.random.normal(k_g, (Cout,), dtype=jnp.float32)
    beta = 0.1 * jax.random.normal(k_be, (Cout,), dtype=jnp.float32)

    out = upscale_block_forward(x, w, b, gamma, beta, scale_factor=s)
    out = jax.block_until_ready(out)

    ref = _reference(x, w, b, gamma, beta, scale_factor=s)
    assert out.shape == (N, Cout, H * s, W * s)
    err = float(jnp.max(jnp.abs(out - ref)))
    assert err < 1e-4, f"mismatch vs reference: {err}"

    print("KERNEL_OK")
</pallas_src>

<mosaic_0001>
module attributes {stable_mosaic.version = 11 : i64} {
  func.func @_stats_kernel(%arg0: i32, %arg1: memref<128x16xf32, #tpu.memory_space<vmem>>, %arg2: memref<16x128xf32, #tpu.memory_space<vmem>>, %arg3: memref<8x128xf32, #tpu.memory_space<vmem>>) attributes {dimension_semantics = [#tpu.dimension_semantics<parallel>], iteration_bounds = array<i64: 1>, scalar_prefetch = 0 : i64, scratch_operands = 0 : i64, tpu.core_type = #tpu.core_type<tc>, window_params = [{transform_indices = @transform_0, window_bounds = array<i64: 128, 16>}, {pipeline_mode = #tpu.pipeline_mode<synchronous>, transform_indices = @transform_1, window_bounds = array<i64: 16, 128>}, {transform_indices = @transform_2, window_bounds = array<i64: 8, 128>}]} {
    %c0 = arith.constant 0 : index
    %c0_0 = arith.constant 0 : index
    %0 = vector.load %arg1[%c0, %c0_0] : memref<128x16xf32, #tpu.memory_space<vmem>>, vector<128x16xf32>
    %c0_1 = arith.constant 0 : index
    %c0_2 = arith.constant 0 : index
    %1 = vector.load %arg2[%c0_1, %c0_2] : memref<16x128xf32, #tpu.memory_space<vmem>>, vector<16x128xf32>
    %cst = arith.constant dense<0.000000e+00> : vector<128x128xf32>
    %2 = tpu.matmul %0, %1, %cst {dimension_numbers = #tpu.dot_dimension_numbers<[1], [0], [0], [1], [0, 0, 1, 1], [], []>} : vector<128x16xf32>, vector<16x128xf32>, vector<128x128xf32> -> vector<128x128xf32>
    %cst_3 = arith.constant dense<0.000000e+00> : vector<128xf32>
    %3 = vector.multi_reduction <add>, %2, %cst_3 [0] : vector<128x128xf32> to vector<128xf32>
    %4 = vector.shape_cast %3 : vector<128xf32> to vector<1x128xf32>
    %5 = arith.mulf %2, %2 : vector<128x128xf32>
    %cst_4 = arith.constant dense<0.000000e+00> : vector<128xf32>
    %6 = vector.multi_reduction <add>, %5, %cst_4 [0] : vector<128x128xf32> to vector<128xf32>
    %7 = vector.shape_cast %6 : vector<128xf32> to vector<1x128xf32>
    %cst_5 = arith.constant 0.000000e+00 : f32
    %8 = vector.broadcast %cst_5 : f32 to vector<6x128xf32>
    %9 = tpu.concatenate %4, %7, %8 in 0 : vector<1x128xf32>, vector<1x128xf32>, vector<6x128xf32> -> vector<8x128xf32>
    %c0_6 = arith.constant 0 : index
    %c0_7 = arith.constant 0 : index
    %10 = vector.load %arg3[%c0_6, %c0_7] : memref<8x128xf32, #tpu.memory_space<vmem>>, vector<8x128xf32>
    tpu.vector_store %arg3[%c0_6, %c0_7], %9 {strides = array<i32>} : memref<8x128xf32, #tpu.memory_space<vmem>>, vector<8x128xf32>,
    return
  }
  func.func @transform_0(%arg0: i32) -> (i32, i32) {
    %c0_i32 = arith.constant 0 : i32
    %c0_i32_0 = arith.constant 0 : i32
    return %arg0, %c0_i32 : i32, i32
  }
  func.func @transform_1(%arg0: i32) -> (i32, i32) {
    %c0_i32 = arith.constant 0 : i32
    %c0_i32_0 = arith.constant 0 : i32
    %c0_i32_1 = arith.constant 0 : i32
    return %c0_i32, %c0_i32_0 : i32, i32
  }
  func.func @transform_2(%arg0: i32) -> (i32, i32) {
    %c0_i32 = arith.constant 0 : i32
    %c0_i32_0 = arith.constant 0 : i32
    return %arg0, %c0_i32 : i32, i32
  }
}

</mosaic_0001>

<bundles_post_ra>
// kernel: tpu_custom_call.1
= control target key start
LH: loop header
LB: loop body
LE: loop exit
PB: predicated region body
PF: predicated region fallthrough
CT: control target
= control target key end

     0   :  { %vm30_vm0 = vcmask 130048   ;;  %s492_s0 = inlined_call_operand.vmem [shape: f32[128,16], index: 0, kind: input, shape index: {}]   ;;  %s493_s1 = inlined_call_operand.vmem [shape: f32[16,128], index: 1, kind: input, shape index: {}]   ;;  %s494_s2 = inlined_call_operand.hbm [shape: f32[8,128], index: 2, kind: output, shape index: {}]  }
   0x1   :  { %v28_v0 = vld [vmem:[%s493_s1] sm:$0xff]  ;;  %v29_v1 = vld [vmem:[%s493_s1 + $0x8] sm:$0xff]  ;;  %v14_v7 = vld [vmem:[%s492_s0 + $0x10] sm:$0xff] }
   0x2   :  { %v12_v2 = vld [vmem:[%s492_s0] sm:$0xff]  ;;  %v363_v3 = vpack.c.bf16 %v29_v1, %v28_v0  ;;  %v13_v5 = vld [vmem:[%s492_s0 + $0x8] sm:$0xff]  ;;  %v22_v8 = vld [vmem:[%s492_s0 + $0x50] sm:$0xff] }
   0x3   :  { %339 = vmatprep.mubr.msk.f32.mxu0 %vm30_vm0, %v12_v2  ;;  %v20_v4 = vld [vmem:[%s492_s0 + $0x40] sm:$0xff]  ;;  %v21_v6 = vld [vmem:[%s492_s0 + $0x48] sm:$0xff] }
   0x4   :  { %364 = vmatprep.subr.bf16.mxu0 %v363_v3  ;;  %367 = vmatprep.subr.bf16.mxu1 %v363_v3 }
   0x5   :  { %366 = vmatpush3.bf16.msra.mxu0 %v363_v3  ;;  %368 = vmatpush3.bf16.msra.mxu1 %v363_v3 }
   0x6   :  { %351 = vmatprep.mubr.msk.f32.mxu1 %vm30_vm0, %v20_v4 }
   0x7   :  { %7 = vsyncpa [#allocation3], 0  ;;  %v15_v9 = vld [vmem:[%s492_s0 + $0x18] sm:$0xff]  ;;  %v16_v11 = vld [vmem:[%s492_s0 + $0x20] sm:$0xff]  ;;  %vm282_vm1 = vcmask 1040384   ;;  %vm284_vm2 = vcmask 1041408  }
   0x8   :  { %340 = vmatmul.mubr.msk.f32.vlgmr.msra.gmra.mrb[0].mxu0 %vm30_vm0, %v13_v5  ;;  %352 = vmatmul.mubr.msk.f32.vlgmr.msra.gmra.mrb[0].mxu1 %vm30_vm0, %v21_v6  ;;  %v23_v10 = vld [vmem:[%s492_s0 + $0x58] sm:$0xff]  ;;  %v24_v12 = vld [vmem:[%s492_s0 + $0x60] sm:$0xff]  ;;  %v17_v13 = vld [vmem:[%s492_s0 + $0x28] sm:$0xff] }
   0x9   :  { %342 = vmatprep.mubr.msk.f32.mxu0 %vm30_vm0, %v14_v7  ;;  %354 = vmatprep.mubr.msk.f32.mxu1 %vm30_vm0, %v22_v8  ;;  %v25_v14 = vld [vmem:[%s492_s0 + $0x68] sm:$0xff]  ;;  %v18_v15 = vld [vmem:[%s492_s0 + $0x30] sm:$0xff]  ;;  %v19_v17 = vld [vmem:[%s492_s0 + $0x38] sm:$0xff] }
   0xa   :  { %v26_v16 = vld [vmem:[%s492_s0 + $0x70] sm:$0xff]  ;;  %v27_v18 = vld [vmem:[%s492_s0 + $0x78] sm:$0xff]  ;;  %s394_s0 = smov [#allocation2]  }
   0xb   :  { %s293_s16 = sshll.u32 %s394_s0, 4  ;;  %s294_s16 = int_to_ptr.vmem [resolvable:$true] %s293_s16 }
   0xc   :  { %343 = vmatmul.mubr.msk.f32.gmra.mrb[2].mxu0 %vm30_vm0, %v15_v9  ;;  %355 = vmatmul.mubr.msk.f32.gmra.mrb[2].mxu1 %vm30_vm0, %v23_v10  ;;  %s370_s17 = scalar_lea.vmem %s294_s16, 128  ;;  %p375_p1 = scmp.lt.s32.totalorder %s294_s16, %s294_s16 }
   0xd   :  { %345 = vmatprep.mubr.msk.f32.mxu0 %vm30_vm0, %v16_v11  ;;  %357 = vmatprep.mubr.msk.f32.mxu1 %vm30_vm0, %v24_v12  ;;  %p371_p0 = scmp.ne.s32.totalorder %s294_s16, %s370_s17  ;;  %p376_p2 = scmp.lt.s32.totalorder %s370_s17, %s370_s17 }
   0xf   :  { %p377_p3 = por %p376_p2, %p375_p1 }
  0x10   :  { %346 = vmatmul.mubr.msk.f32.gmra.mrb[4].mxu0 %vm30_vm0, %v17_v13  ;;  %358 = vmatmul.mubr.msk.f32.gmra.mrb[4].mxu1 %vm30_vm0, %v25_v14 }
  0x11   :  { %348 = vmatprep.mubr.msk.f32.mxu0 %vm30_vm0, %v18_v15  ;;  %360 = vmatprep.mubr.msk.f32.mxu1 %vm30_vm0, %v26_v16  ;;  %p378_p4 = pnand %p377_p3, %p371_p0 }
  0x14   :  { %349 = vmatmul.mubr.msk.f32.gmra.mrb[6].mxu0 %vm30_vm0, %v19_v17  ;;  %361 = vmatmul.mubr.msk.f32.gmra.mrb[6].mxu1 %vm30_vm0, %v27_v18 }
  0xdb   :  { %v341_v19 = vpop.f32.mrb[0].mxu0  ;;  %v353_v20 = vpop.f32.mrb[0].mxu1 }
  0xdc   :  { %v246_v21 = vmul.f32 %v341_v19, %v341_v19  ;;  %v145_v22 = vpop.f32.mrb[1].mxu0  ;;  %v185_v23 = vpop.f32.mrb[1].mxu1  ;;  %v254_v59 = vmul.f32 %v353_v20, %v353_v20 }
  0xdd   :  { %v224_v24 = vadd.f32 %v341_v19, %v145_v22  ;;  %v245_v25 = vmul.f32 %v145_v22, %v145_v22  ;;  %v253_v56 = vmul.f32 %v185_v23, %v185_v23 }
  0xdf   :  { %v261_v26 = vadd.f32 %v246_v21, %v245_v25  ;;  %v344_v27 = vpop.f32.mrb[2].mxu0  ;;  %v356_v28 = vpop.f32.mrb[2].mxu1 }
  0xe0   :  { %v155_v29 = vpop.f32.mrb[3].mxu0  ;;  %v195_v30 = vpop.f32.mrb[3].mxu1  ;;  %v248_v33 = vmul.f32 %v344_v27, %v344_v27  ;;  %v256_v1 = vmul.f32 %v356_v28, %v356_v28 }
  0xe1   :  { %v225_v31 = vadd.f32 %v224_v24, %v155_v29  ;;  %v247_v32 = vmul.f32 %v155_v29, %v155_v29  ;;  %v255_v62 = vmul.f32 %v195_v30, %v195_v30 }
  0xe3   :  { %v262_v34 = vadd.f32 %v261_v26, %v247_v32  ;;  %v347_v35 = vpop.f32.mrb[4].mxu0  ;;  %v226_v36 = vadd.f32 %v344_v27, %v225_v31  ;;  %v359_v37 = vpop.f32.mrb[4].mxu1 }
  0xe4   :  { %v165_v38 = vpop.f32.mrb[5].mxu0  ;;  %v205_v39 = vpop.f32.mrb[5].mxu1  ;;  %v250_v43 = vmul.f32 %v347_v35, %v347_v35  ;;  %v258_v7 = vmul.f32 %v359_v37, %v359_v37 }
  0xe5   :  { %v227_v40 = vadd.f32 %v226_v36, %v165_v38  ;;  %v249_v41 = vmul.f32 %v165_v38, %v165_v38  ;;  %v263_v42 = vadd.f32 %v262_v34, %v248_v33  ;;  %v257_v4 = vmul.f32 %v205_v39, %v205_v39 }
  0xe7   :  { %v264_v44 = vadd.f32 %v263_v42, %v249_v41  ;;  %v350_v45 = vpop.f32.mrb[6].mxu0  ;;  %v228_v46 = vadd.f32 %v347_v35, %v227_v40  ;;  %v362_v47 = vpop.f32.mrb[6].mxu1 }
  0xe8   :  { %v175_v48 = vpop.f32.mrb[7].mxu0  ;;  %v215_v49 = vpop.f32.mrb[7].mxu1  ;;  %v252_v53 = vmul.f32 %v350_v45, %v350_v45  ;;  %v260_v13 = vmul.f32 %v362_v47, %v362_v47 }
  0xe9   :  { %v229_v50 = vadd.f32 %v228_v46, %v175_v48  ;;  %v251_v51 = vmul.f32 %v175_v48, %v175_v48  ;;  %v265_v52 = vadd.f32 %v264_v44, %v250_v43  ;;  %v259_v10 = vmul.f32 %v215_v49, %v215_v49 }
  0xeb   :  { %v230_v54 = vadd.f32 %v350_v45, %v229_v50  ;;  %v266_v55 = vadd.f32 %v265_v52, %v251_v51 }
  0xed   :  { %v267_v57 = vadd.f32 %v266_v55, %v252_v53  ;;  %v231_v58 = vadd.f32 %v230_v54, %v185_v23 }
  0xef   :  { %v268_v60 = vadd.f32 %v267_v57, %v253_v56  ;;  %v232_v61 = vadd.f32 %v353_v20, %v231_v58 }
  0xf1   :  { %v233_v63 = vadd.f32 %v232_v61, %v195_v30  ;;  %v269_v0 = vadd.f32 %v268_v60, %v254_v59 }
  0xf3   :  { %v270_v2 = vadd.f32 %v269_v0, %v255_v62  ;;  %v234_v3 = vadd.f32 %v356_v28, %v233_v63 }
  0xf5   :  { %v235_v5 = vadd.f32 %v234_v3, %v205_v39  ;;  %v271_v6 = vadd.f32 %v270_v2, %v256_v1 }
  0xf7   :  { %v272_v8 = vadd.f32 %v271_v6, %v257_v4  ;;  %v236_v9 = vadd.f32 %v359_v37, %v235_v5 }
  0xf9   :  { %v237_v11 = vadd.f32 %v236_v9, %v215_v49  ;;  %v273_v12 = vadd.f32 %v272_v8, %v258_v7 }
  0xfb   :  { %v238_v14 = vadd.f32 %v362_v47, %v237_v11  ;;  %v274_v15 = vadd.f32 %v273_v12, %v259_v10 }
  0xfd   :  { %v239_v16 = vrot.slane %v238_v14, 4  ;;  %v275_v17 = vadd.f32 %v274_v15, %v260_v13 }
  0xff   :  { %v240_v18 = vadd.f32 %v239_v16, %v238_v14  ;;  %v276_v19 = vrot.slane %v275_v17, 4 }
 0x101   :  { %v241_v20 = vrot.slane %v240_v18, 2  ;;  %v277_v21 = vadd.f32 %v276_v19, %v275_v17 }
 0x103   :  { %v242_v22 = vadd.f32 %v241_v20, %v240_v18  ;;  %v278_v23 = vrot.slane %v277_v21, 2 }
 0x105   :  { %v243_v24 = vrot.slane %v242_v22, 1  ;;  %v279_v25 = vadd.f32 %v278_v23, %v277_v21 }
 0x107   :  { %v280_v26 = vrot.slane %v279_v25, 1  ;;  %v244_v27 = vadd.f32 %v243_v24, %v242_v22 }
 0x109   :  { %v281_v28 = vadd.f32 %v280_v26, %v279_v25 }
 0x10b   :  { %v283_v29 = vsel %vm282_vm1, %v244_v27, %v281_v28 }
 0x10c   :  { %v285_v30 = vsel %vm284_vm2, %v283_v29, 0.0 }
 0x10d   :  { %286 = vst [vmem:[#allocation2] sm:$0xff] %v285_v30 }
 0x10e   :  { %381 = shalt.err (!%p378_p4)
}
 0x10f   :  { %s382_s19 = scalar_lea.hbm %s494_s2, 128 }
 0x110   :  { %p383_p5 = scmp.ne.s32.totalorder %s494_s2, %s382_s19  ;;  %p386_p6 = scmp.lt.u32.totalorder %s382_s19, %s494_s2 }
 0x112   :  { %p388_p7 = pnand %p386_p6, %p383_p5 }
 0x114   :  { %391 = shalt.err (!%p388_p7)
}
 0x115   :  { %296 = dma.vmem_to_hbm [thread:$0]  %s294_s16, 128, %s494_s2, [#allocation3]  }
 0x116   :  { %392 = dma.done.wait [#allocation3], 128  }
 0x117   :  { %393 = vsyncadd [#allocation3], 4294967168 }
 0x118   :  { %300 = vsyncpa [#allocation3], 1 }

</bundles_post_ra>
